<compile_context>
chip_gen: v6e
topology: v6e:2x2x1
jax: 0.10.0
libtpu: 0.0.40
codegen_flags: <defaults>
</compile_context>

<pallas_src>
import jax
import jax.numpy as jnp
from jax.experimental import pallas as pl
from jax.experimental.pallas import tpu as pltpu


def _affine_kernel(x_ref, scale_ref, bias_ref, o_ref):
    # scale/bias are either (tile_r, 1) (lane broadcast, Layout A) or
    # (1, tile_c) (sublane broadcast, Layout B); jnp broadcasting handles both.
    o_ref[...] = (x_ref[...] * scale_ref[...] + bias_ref[...]).astype(o_ref.dtype)


def _pick_tile_c(cols, cap):
    """Full extent if it fits, else a multiple of 128 <= cap that divides cols
    evenly if possible (avoids ragged, masked last lane tiles)."""
    if cols <= cap:
        return cols
    cap128 = max(128, (cap // 128) * 128)
    t = cap128
    while t >= 1024:
        if cols % t == 0:
            return t
        t -= 128
    return cap128


def frozen_batch_norm_2d(x, weight, bias, running_mean, running_var,
                         *, max_block_bytes=4 * 1024 * 1024):
    """FrozenBatchNorm2d forward. x: (N, C, H, W) NCHW. Returns (N, C, H, W)."""
    n, c, h, w = x.shape
    dt = x.dtype
    itemsize = jnp.dtype(dt).itemsize
    sub_align = {4: 8, 2: 16, 1: 32}.get(itemsize, 8)
    hw = h * w

    # Fused per-channel affine, computed once in float32 for numerics.
    # (Spec module has NO eps; we intentionally match it exactly.)
    w32 = weight.astype(jnp.float32)
    b32 = bias.astype(jnp.float32)
    rm32 = running_mean.astype(jnp.float32)
    rv32 = running_var.astype(jnp.float32)
    scale_c = w32 * jax.lax.rsqrt(rv32)          # (C,)
    bias_c = b32 - rm32 * scale_c                # (C,)

    if hw % 128 == 0:
        # ---- Layout A: (N*C, H*W), per-row scale/bias, lane broadcast. ----
        rows, cols = n * c, hw
        x2d = x.reshape(rows, cols)
        scale_2d = jnp.tile(scale_c, n).reshape(rows, 1)     # tiny, f32
        bias_2d = jnp.tile(bias_c, n).reshape(rows, 1)

        tile_c = _pick_tile_c(cols, 8192)
        # Per-row bytes of the x block PLUS the (tile_r,1)->128-lane-padded
        # f32 scale/bias blocks (previously unaccounted hidden VMEM).
        row_bytes = tile_c * itemsize + 2 * 128 * 4
        rows_budget = max(sub_align, max_block_bytes // row_bytes)
        if rows <= rows_budget:
            tile_r = rows
        else:
            tile_r = max(sub_align, (rows_budget // sub_align) * sub_align)

        grid = (pl.cdiv(rows, tile_r), pl.cdiv(cols, tile_c))

        # Megacore (v7x has 2 TCs): avoid a 1x1 grid for non-trivial data so a
        # "parallel" axis has >=2 blocks to shard across cores.
        if grid == (1, 1) and rows >= 2 * sub_align and rows * cols * itemsize > (1 << 20):
            tile_r = max(sub_align, ((rows // 2) // sub_align) * sub_align)
            grid = (pl.cdiv(rows, tile_r), pl.cdiv(cols, tile_c))

        in_specs = [
            pl.BlockSpec((tile_r, tile_c), lambda i, j: (i, j)),
            pl.BlockSpec((tile_r, 1), lambda i, j: (i, 0)),
            pl.BlockSpec((tile_r, 1), lambda i, j: (i, 0)),
        ]
        out_specs = pl.BlockSpec((tile_r, tile_c), lambda i, j: (i, j))
        sb_pad_bytes = 2 * ((tile_r + 7) // 8) * 8 * 128 * 4
    else:
        # ---- Layout B: (N, C*H*W), per-column scale/bias, sublane broadcast.
        # Restores lane-dense, unmasked stores for small / misaligned H*W. ----
        rows, cols = n, c * hw
        x2d = x.reshape(rows, cols)
        scale_2d = jnp.repeat(scale_c, hw).reshape(1, cols)   # f32 (1, C*H*W)
        bias_2d = jnp.repeat(bias_c, hw).reshape(1, cols)

        tile_r = rows if rows <= 256 else 256                 # N is small; 256 % sub_align == 0
        # Per-column bytes: x column + 8-sublane-padded f32 scale/bias columns.
        col_bytes = tile_r * itemsize + 2 * 8 * 4
        cap_c = max(128, (max_block_bytes // col_bytes) // 128 * 128)
        tile_c = _pick_tile_c(cols, cap_c)

        # Column axis OUTER: the scale/bias block index only changes on the
        # outer axis, so those rows are fetched once per column tile.
        grid = (pl.cdiv(cols, tile_c), pl.cdiv(rows, tile_r))
        in_specs = [
            pl.BlockSpec((tile_r, tile_c), lambda jc, ir: (ir, jc)),
            pl.BlockSpec((1, tile_c), lambda jc, ir: (0, jc)),
            pl.BlockSpec((1, tile_c), lambda jc, ir: (0, jc)),
        ]
        out_specs = pl.BlockSpec((tile_r, tile_c), lambda jc, ir: (ir, jc))
        sb_pad_bytes = 2 * 8 * tile_c * 4

    # VMEM budget: double-buffered in + out tiles plus padded scale/bias.
    x_block_bytes = tile_r * tile_c * itemsize
    pipeline_bytes = 2 * (2 * x_block_bytes + sb_pad_bytes)
    vmem_limit = min(max(32 * 1024 * 1024, pipeline_bytes + (8 << 20)),
                     48 * 1024 * 1024)

    cost = pl.CostEstimate(
        flops=2 * rows * cols,
        transcendentals=0,
        bytes_accessed=2 * rows * cols * itemsize + 2 * scale_2d.size * 4,
    )

    y2d = pl.pallas_call(
        _affine_kernel,
        out_shape=jax.ShapeDtypeStruct((rows, cols), dt),
        grid=grid,
        in_specs=in_specs,
        out_specs=out_specs,
        compiler_params=pltpu.CompilerParams(
            dimension_semantics=("parallel", "parallel"),
            vmem_limit_bytes=vmem_limit),
        cost_estimate=cost,
    )(x2d, scale_2d, bias_2d)

    return y2d.reshape(n, c, h, w)


def _reference(x, weight, bias, running_mean, running_var):
    c = x.shape[1]
    scale = weight * jax.lax.rsqrt(running_var)
    b = bias - running_mean * scale
    return x * scale.reshape(1, c, 1, 1) + b.reshape(1, c, 1, 1)


if __name__ == "__main__":
    key = jax.random.PRNGKey(0)
    k1, k2, k3, k4, k5, k6 = jax.random.split(key, 6)

    # Primary (lane-aligned H*W -> Layout A).
    N, C, H, W = 2, 4, 16, 16
    x = jax.random.normal(k1, (N, C, H, W), dtype=jnp.float32)
    weight = jax.random.normal(k2, (C,), dtype=jnp.float32) * 0.1 + 1.0
    bias = jax.random.normal(k3, (C,), dtype=jnp.float32) * 0.1
    running_mean = jax.random.normal(k4, (C,), dtype=jnp.float32) * 0.1
    running_var = jax.random.uniform(k5, (C,), dtype=jnp.float32,
                                     minval=0.5, maxval=1.5)

    y = frozen_batch_norm_2d(x, weight, bias, running_mean, running_var)
    y = jax.block_until_ready(y)
    y_ref = _reference(x, weight, bias, running_mean, running_var)
    assert y.shape == (N, C, H, W)
    assert jnp.allclose(y, y_ref, atol=1e-5, rtol=1e-5)

    # Secondary sanity check: 128-misaligned spatial (7x7 -> Layout B).
    x2 = jax.random.normal(k6, (N, C, 7, 7), dtype=jnp.float32)
    y2 = frozen_batch_norm_2d(x2, weight, bias, running_mean, running_var)
    y2 = jax.block_until_ready(y2)
    y2_ref = _reference(x2, weight, bias, running_mean, running_var)
    assert jnp.allclose(y2, y2_ref, atol=1e-5, rtol=1e-5)

    print("KERNEL_OK")
</pallas_src>

<mosaic_0001>
module attributes {stable_mosaic.version = 11 : i64} {
  func.func @_affine_kernel(%arg0: i32, %arg1: i32, %arg2: memref<8x256xf32, #tpu.memory_space<vmem>>, %arg3: memref<8x1xf32, #tpu.memory_space<vmem>>, %arg4: memref<8x1xf32, #tpu.memory_space<vmem>>, %arg5: memref<8x256xf32, #tpu.memory_space<vmem>>) attributes {dimension_semantics = [#tpu.dimension_semantics<parallel>, #tpu.dimension_semantics<parallel>], iteration_bounds = array<i64: 1, 1>, scalar_prefetch = 0 : i64, scratch_operands = 0 : i64, tpu.core_type = #tpu.core_type<tc>, window_params = [{transform_indices = @transform_0, window_bounds = array<i64: 8, 256>}, {transform_indices = @transform_1, window_bounds = array<i64: 8, 1>}, {transform_indices = @transform_2, window_bounds = array<i64: 8, 1>}, {transform_indices = @transform_3, window_bounds = array<i64: 8, 256>}]} {
    %c0 = arith.constant 0 : index
    %c0_0 = arith.constant 0 : index
    %0 = vector.load %arg2[%c0, %c0_0] : memref<8x256xf32, #tpu.memory_space<vmem>>, vector<8x256xf32>
    %c0_1 = arith.constant 0 : index
    %c0_2 = arith.constant 0 : index
    %1 = vector.load %arg3[%c0_1, %c0_2] : memref<8x1xf32, #tpu.memory_space<vmem>>, vector<8x1xf32>
    %2 = vector.broadcast %1 : vector<8x1xf32> to vector<8x256xf32>
    %3 = arith.mulf %0, %2 : vector<8x256xf32>
    %c0_3 = arith.constant 0 : index
    %c0_4 = arith.constant 0 : index
    %4 = vector.load %arg4[%c0_3, %c0_4] : memref<8x1xf32, #tpu.memory_space<vmem>>, vector<8x1xf32>
    %5 = vector.broadcast %4 : vector<8x1xf32> to vector<8x256xf32>
    %6 = arith.addf %3, %5 : vector<8x256xf32>
    %c0_5 = arith.constant 0 : index
    %c0_6 = arith.constant 0 : index
    %7 = vector.load %arg5[%c0_5, %c0_6] : memref<8x256xf32, #tpu.memory_space<vmem>>, vector<8x256xf32>
    tpu.vector_store %arg5[%c0_5, %c0_6], %6 {strides = array<i32>} : memref<8x256xf32, #tpu.memory_space<vmem>>, vector<8x256xf32>,
    return
  }
  func.func @transform_0(%arg0: i32, %arg1: i32) -> (i32, i32) {
    %c0_i32 = arith.constant 0 : i32
    return %arg0, %arg1 : i32, i32
  }
  func.func @transform_1(%arg0: i32, %arg1: i32) -> (i32, i32) {
    %c0_i32 = arith.constant 0 : i32
    %c0_i32_0 = arith.constant 0 : i32
    return %arg0, %c0_i32 : i32, i32
  }
  func.func @transform_2(%arg0: i32, %arg1: i32) -> (i32, i32) {
    %c0_i32 = arith.constant 0 : i32
    %c0_i32_0 = arith.constant 0 : i32
    return %arg0, %c0_i32 : i32, i32
  }
  func.func @transform_3(%arg0: i32, %arg1: i32) -> (i32, i32) {
    %c0_i32 = arith.constant 0 : i32
    return %arg0, %arg1 : i32, i32
  }
}

</mosaic_0001>

<bundles_post_ra>
// kernel: tpu_custom_call.1
= control target key start
LH: loop header
LB: loop body
LE: loop exit
PB: predicated region body
PF: predicated region fallthrough
CT: control target
= control target key end

     0   :  { %v74_v1 = vmov 0   ;;  %s111_s0 = inlined_call_operand.vmem [shape: f32[8,256], index: 0, kind: input, shape index: {}]   ;;  %s112_s1 = inlined_call_operand.vmem [shape: f32[8,1], index: 1, kind: input, shape index: {}]   ;;  %s113_s2 = inlined_call_operand.vmem [shape: f32[8,1], index: 2, kind: input, shape index: {}]   ;;  %s114_s3 = inlined_call_operand.hbm [shape: f32[8,256], index: 3, kind: output, shape index: {}]  }
   0x1   :  { %v17_v0 = vld [vmem:[%s112_s1] sm:$0xff]  ;;  %51 = vset.pattern.permute.xlu0 %v74_v1 }
   0x2   :  { %8 = vsyncpa [#allocation3], 0  ;;  %20 = vperm.xlu0 %51, %v17_v0   ;;  %v25_v2 = vld [vmem:[%s113_s2] sm:$0xff]  ;;  %v16_v5 = vld [vmem:[%s111_s0 + $0x8] sm:$0xff]  ;;  %s75_s20 = smov [#allocation2]  }
   0x3   :  { %v15_v4 = vld [vmem:[%s111_s0] sm:$0xff]  ;;  %s41_s1 = sshll.u32 %s75_s20, 4  ;;  %s42_s1 = int_to_ptr.vmem [resolvable:$true] %s41_s1 }
   0x4   :  { %s52_s2 = scalar_lea.vmem %s42_s1, 256  ;;  %p57_p1 = scmp.lt.s32.totalorder %s42_s1, %s42_s1 }
   0x5   :  { %p53_p0 = scmp.ne.s32.totalorder %s42_s1, %s52_s2  ;;  %p58_p2 = scmp.lt.s32.totalorder %s52_s2, %s52_s2 }
   0x6   :  { %28 = vperm.xlu0 %51, %v25_v2  }
   0x7   :  { %p59_p3 = por %p58_p2, %p57_p1 }
   0x9   :  { %p60_p4 = pnand %p59_p3, %p53_p0 }
  0x7d   :  { %v21_v3 = vpop.permute.xlu0 %20 }
  0x7e   :  { %v23_v6 = vmul.f32 %v21_v3, %v15_v4  ;;  %v24_v7 = vmul.f32 %v21_v3, %v16_v5 }
  0x81   :  { %v29_v8 = vpop.permute.xlu0 %28 }
  0x82   :  { %v31_v9 = vadd.f32 %v29_v8, %v23_v6  ;;  %v32_v10 = vadd.f32 %v29_v8, %v24_v7 }
  0x84   :  { %33 = vst [vmem:[#allocation2] sm:$0xff] %v31_v9  ;;  %34 = vst [vmem:[#allocation2 + $0x8] sm:$0xff] %v32_v10 }
  0x85   :  { %63 = shalt.err (!%p60_p4)
}
  0x86   :  { %44 = dma.vmem_to_hbm [thread:$0]  %s42_s1, 256, %s114_s3, [#allocation3]  }
  0x87   :  { %72 = dma.done.wait [#allocation3], 256  }
  0x88   :  { %73 = vsyncadd [#allocation3], 4294967040 }
  0x89   :  { %48 = vsyncpa [#allocation3], 1 }

</bundles_post_ra>
